<compile_context>
chip_gen: v7x
topology: tpu7x:2x2x1
jax: 0.10.0
libtpu: 0.0.40
codegen_flags: <defaults>
</compile_context>

<pallas_src>
import jax
import jax.numpy as jnp
from jax.experimental import pallas as pl
from jax.experimental.pallas import tpu as pltpu


def _identity_copy_kernel(x_hbm, o_hbm, sem):
    # Empty nn.Sequential() == identity: one whole-tensor HBM->HBM DMA.
    cp = pltpu.make_async_copy(x_hbm, o_hbm, sem)
    cp.start()
    cp.wait()


@jax.jit
def _pallas_identity(x):
    return pl.pallas_call(
        _identity_copy_kernel,
        out_shape=jax.ShapeDtypeStruct(x.shape, x.dtype),
        # Leave both operands in HBM; the DMA engine does the copy directly,
        # no VMEM staging, no grid, no (8,128) block constraints.
        in_specs=[pl.BlockSpec(memory_space=pl.ANY)],
        out_specs=pl.BlockSpec(memory_space=pl.ANY),
        scratch_shapes=[pltpu.SemaphoreType.DMA(())],
    )(x)


def wireframe_discriminator_forward(x, *, use_pallas: bool = True):
    """Apply the (empty == identity) discriminator pipeline `self.main` to x.

    use_pallas=False is the true fast path (returns x, zero HBM traffic);
    use_pallas=True runs the identity through a single HBM->HBM DMA kernel.
    """
    if not use_pallas:
        return x
    return _pallas_identity(x)


class WireframeDiscriminatorPallas:
    """Mirror of the PyTorch WireframeDiscriminator.

    __init__ defines no parameters (empty Sequential), so there is nothing to
    initialize; kept as a class for structural parity with the nn.Module.
    """

    def __init__(self, n_gpu: int, use_pallas: bool = True):
        self.n_gpu = n_gpu
        self.use_pallas = use_pallas
        # self.main = empty Sequential -> identity; no parameters.

    def __call__(self, x):
        return wireframe_discriminator_forward(x, use_pallas=self.use_pallas)


if __name__ == "__main__":
    key = jax.random.PRNGKey(0)
    # Small NCHW input consistent with a GAN discriminator: batch=2, ch=4, 16x16.
    x = jax.random.normal(key, (2, 4, 16, 16), dtype=jnp.float32)

    model = WireframeDiscriminatorPallas(n_gpu=1)
    out = model(x)
    out = jax.block_until_ready(out)

    # Empty Sequential == identity: output must equal input exactly.
    assert out.shape == x.shape
    assert out.dtype == x.dtype
    assert bool(jnp.all(out == x))

    # Also exercise the zero-cost fast path for parity.
    out_fast = wireframe_discriminator_forward(x, use_pallas=False)
    assert bool(jnp.all(out_fast == x))

    print("KERNEL_OK")
</pallas_src>

<mosaic_0001>
module attributes {stable_mosaic.version = 11 : i64} {
  func.func @_identity_copy_kernel(%arg0: memref<2x4x16x16xf32, #tpu.memory_space<any>>, %arg1: memref<2x4x16x16xf32, #tpu.memory_space<any>>, %arg2: memref<!tpu.dma_semaphore, #tpu.memory_space<semaphore_mem>>) attributes {dimension_semantics = [], scalar_prefetch = 0 : i64, scratch_operands = 1 : i64, tpu.core_type = #tpu.core_type<tc>} {
    tpu.enqueue_dma source(%arg0 : memref<2x4x16x16xf32, #tpu.memory_space<any>>) target(%arg1 : memref<2x4x16x16xf32, #tpu.memory_space<any>>) target_semaphore(%arg2 : memref<!tpu.dma_semaphore, #tpu.memory_space<semaphore_mem>>)
    tpu.wait_dma2 semaphore(%arg2 : memref<!tpu.dma_semaphore, #tpu.memory_space<semaphore_mem>>) src(%arg0 : memref<2x4x16x16xf32, #tpu.memory_space<any>>) dst(%arg1 : memref<2x4x16x16xf32, #tpu.memory_space<any>>)
    return
  }
}

</mosaic_0001>

<bundles_post_ra>
// kernel: _pallas_identity.1
= control target key start
LH: loop header
LB: loop body
LE: loop exit
PB: predicated region body
PF: predicated region fallthrough
CT: control target
= control target key end

     0   :  { %s36_s6 = smov [#allocation2]   ;;  %s37_s7 = smov [#allocation3]   ;;  %s55_s0 = inlined_call_operand.hbm [shape: f32[2,4,16,16], index: 0, kind: input, shape index: {}]   ;;  %s56_s1 = inlined_call_operand.hbm [shape: f32[2,4,16,16], index: 1, kind: output, shape index: {}]  }
   0x1   :  { %s38_s8 = smov 0  }
   0x2   :  { %18 = dma.general %s55_s0, 2048, %s56_s1, %s36_s6, %s37_s7, [#allocation4], %s38_s8, 0  }
   0x3   :  { %34 = dma.done.wait [#allocation2], 2048 }
   0x4   :  { %35 = vsyncadd [#allocation2], 4294965248 }
   0x5   :  { %24 = vsyncmov [#allocation2] }
   0x8   :  { %s25_s13 = vpop.sfrf %24 }
   0x9   :  { %p30_p0 = scmp.ne.s32.totalorder %s25_s13, 0 }
   0xb   :  { %29 = shalt.err (%p30_p0)  }

</bundles_post_ra>
